<compile_context>
chip_gen: v5e
topology: v5e:2x2
jax: 0.10.0
libtpu: 0.0.40
codegen_flags: <defaults>
</compile_context>

<pallas_src>
import jax
import jax.numpy as jnp
from jax import lax
from jax.experimental import pallas as pl
from jax.experimental.pallas import tpu as pltpu


def _pick_tile(n, target):
    """Largest multiple-of-8 divisor of n that is <= target (else n itself)."""
    if n <= target:
        return n
    for t in range(min(target, n), 7, -1):
        if t % 8 == 0 and n % t == 0:
            return t
    # TODO(synk): pad + pl.when-mask ragged extents instead of one full block.
    return n


# --------------------------- kernel 1: QKV projection ------------------------
def _qkv_proj_kernel(x_ref, w_ref, o_ref):
    # x_ref: (tm, E) bf16   w_ref: (E_in, E_out) bf16   o_ref: (tm, E) bf16
    o_ref[...] = lax.dot_general(
        x_ref[...], w_ref[...], (((1,), (0,)), ((), ())),
        preferred_element_type=jnp.float32).astype(o_ref.dtype)


def qkv_projection(x_flat, w_qkv_t, *, tm_target=256):
    # x_flat: (M, E) bf16; w_qkv_t: (3*H, E_in, E_out) bf16 (pre-transposed)
    M, E = x_flat.shape
    G = w_qkv_t.shape[0]
    tm = _pick_tile(M, tm_target)
    n_m = M // tm
    return pl.pallas_call(
        _qkv_proj_kernel,
        out_shape=jax.ShapeDtypeStruct((G, M, E), jnp.bfloat16),
        grid=(n_m, G),
        in_specs=[
            pl.BlockSpec((tm, E), lambda m, g: (m, 0)),        # resident per m
            pl.BlockSpec((None, E, E), lambda m, g: (g, 0, 0)),  # pipelined
        ],
        out_specs=pl.BlockSpec((None, tm, E), lambda m, g: (g, m, 0)),
        compiler_params=pltpu.CompilerParams(
            dimension_semantics=("parallel", "parallel"),
            vmem_limit_bytes=32 * 1024 * 1024),
    )(x_flat, w_qkv_t)


# --------------- kernel 2: fused flash attention + fc_out --------------------
def _attn_fc_kernel(q_ref, k_ref, v_ref, wfc_ref, b_ref, o_ref,
                    m_sc, l_sc, acc_sc, oacc_sc):
    h = pl.program_id(2)
    kv = pl.program_id(3)
    tq = q_ref.shape[0]
    tk = k_ref.shape[0]
    q_start = pl.program_id(1) * tq
    k_start = kv * tk

    @pl.when(kv == 0)
    def _init():
        m_sc[...] = jnp.full(m_sc.shape, -jnp.inf, dtype=m_sc.dtype)
        l_sc[...] = jnp.zeros(l_sc.shape, dtype=l_sc.dtype)
        acc_sc[...] = jnp.zeros(acc_sc.shape, dtype=acc_sc.dtype)

    # Skip kv blocks that lie entirely above the causal diagonal.
    @pl.when(k_start <= q_start + tq - 1)
    def _compute():
        q = q_ref[...]                               # (tq, E) bf16
        k = k_ref[...]                               # (tk, E) bf16
        v = v_ref[...]                               # (tk, E) bf16
        # energy = q . k  (no 1/sqrt(d) scaling: matches the PyTorch module)
        s = lax.dot_general(q, k, (((1,), (1,)), ((), ())),
                            preferred_element_type=jnp.float32)   # (tq, tk)
        row = q_start + lax.broadcasted_iota(jnp.int32, (tq, tk), 0)
        col = k_start + lax.broadcasted_iota(jnp.int32, (tq, tk), 1)
        s = jnp.where(col > row, jnp.float32(-1e30), s)

        m_prev = m_sc[...]
        m_new = jnp.maximum(m_prev, jnp.max(s, axis=-1, keepdims=True))
        alpha = jnp.exp(m_prev - m_new)
        p = jnp.exp(s - m_new)
        l_sc[...] = alpha * l_sc[...] + jnp.sum(p, axis=-1, keepdims=True)
        acc_sc[...] = alpha * acc_sc[...] + lax.dot_general(
            p.astype(jnp.bfloat16), v, (((1,), (0,)), ((), ())),
            preferred_element_type=jnp.float32)
        m_sc[...] = m_new

    @pl.when(kv == pl.num_programs(3) - 1)
    def _finalize():
        inv_l = pl.reciprocal(l_sc[...], approx=True)        # EUP slot
        ctx = (acc_sc[...] * inv_l).astype(jnp.bfloat16)     # (tq, E)
        head_out = lax.dot_general(                          # ctx @ Wfc_h
            ctx, wfc_ref[...], (((1,), (0,)), ((), ())),
            preferred_element_type=jnp.float32)              # (tq, E)

        @pl.when(h == 0)
        def _():
            oacc_sc[...] = head_out + b_ref[...]

        @pl.when(h != 0)
        def _():
            oacc_sc[...] = oacc_sc[...] + head_out

        @pl.when(h == pl.num_programs(2) - 1)
        def _():
            o_ref[...] = oacc_sc[...].astype(o_ref.dtype)


def flash_attention_fc_out(qkv, w_fc_t, b_fc, *, B, T, H, E,
                           tq_target=256, tk_target=256):
    # qkv: (3*H, B*T, E) bf16; w_fc_t: (H, E_in, E_out) bf16; b_fc: (1, E) f32
    M = B * T
    tq = _pick_tile(T, tq_target)
    tk = _pick_tile(T, tk_target)
    n_q = T // tq
    n_kv = T // tk

    # qkv group layout: g = qkv_idx * H + h  (Q heads, then K heads, then V).
    q_map = lambda b, qi, h, kv: (h, b * n_q + qi, 0)
    k_map = lambda b, qi, h, kv: (H + h, b * n_kv + kv, 0)
    v_map = lambda b, qi, h, kv: (2 * H + h, b * n_kv + kv, 0)

    return pl.pallas_call(
        _attn_fc_kernel,
        out_shape=jax.ShapeDtypeStruct((M, E), jnp.float32),
        grid=(B, n_q, H, n_kv),
        in_specs=[
            pl.BlockSpec((None, tq, E), q_map),
            pl.BlockSpec((None, tk, E), k_map),
            pl.BlockSpec((None, tk, E), v_map),
            pl.BlockSpec((None, E, E), lambda b, qi, h, kv: (h, 0, 0)),
            pl.BlockSpec((1, E), lambda b, qi, h, kv: (0, 0)),   # bias resident
        ],
        out_specs=pl.BlockSpec((tq, E), lambda b, qi, h, kv: (b * n_q + qi, 0)),
        scratch_shapes=[
            pltpu.VMEM((tq, 1), jnp.float32),   # m: running max
            pltpu.VMEM((tq, 1), jnp.float32),   # l: running softmax denom
            pltpu.VMEM((tq, E), jnp.float32),   # per-head context accumulator
            pltpu.VMEM((tq, E), jnp.float32),   # fc_out accumulator over heads
        ],
        compiler_params=pltpu.CompilerParams(
            dimension_semantics=("parallel", "parallel", "arbitrary", "arbitrary"),
            vmem_limit_bytes=32 * 1024 * 1024),
    )(qkv, qkv, qkv, w_fc_t, b_fc)


# ------------------------- weight prep (hoisted) -----------------------------
def prepare_params(params):
    """One-time weight prep outside the forward path: stack per-head Q/K/V
    weights, pre-transpose to (in, out), slice fc_out per head, cast MXU
    operands to bf16."""
    H, E, _ = params["wq"].shape
    w_qkv = jnp.stack([params["wq"], params["wk"], params["wv"]], axis=0)  # (3,H,E,E) (out,in)
    w_qkv_t = jnp.swapaxes(w_qkv, -1, -2).reshape(3 * H, E, E).astype(jnp.bfloat16)
    # fc_out: y = concat_h(ctx_h) @ W_fc^T + b == sum_h ctx_h @ W_fc[:, hE:(h+1)E]^T + b
    w_fc_t = params["w_fc"].reshape(E, H, E).transpose(1, 2, 0).astype(jnp.bfloat16)
    b_fc = params["b_fc"].reshape(1, E).astype(jnp.float32)
    return {"H": H, "E": E, "w_qkv_t": w_qkv_t, "w_fc_t": w_fc_t, "b_fc": b_fc}


# ----------------------------- full module forward ---------------------------
def self_attention_forward(x, prepared):
    B, T, E = x.shape
    H = prepared["H"]
    assert E == prepared["E"]
    x_flat = x.reshape(B * T, E).astype(jnp.bfloat16)
    qkv = qkv_projection(x_flat, prepared["w_qkv_t"])              # (3H, B*T, E) bf16
    # TODO(synk): optionally fuse the projection into the flash kernel to also
    # drop the bf16 qkv HBM round trip (recompute-vs-bandwidth tradeoff).
    out = flash_attention_fc_out(qkv, prepared["w_fc_t"], prepared["b_fc"],
                                 B=B, T=T, H=H, E=E)               # (B*T, E) f32
    return out.reshape(B, T, E)


# ----------------------------- pure-JAX reference ----------------------------
# Mirrors the kernel's precision policy (bf16 matmul operands, f32 accumulate,
# f32 softmax) so the tolerance check validates structure, not rounding.
def reference_forward(x, params):
    B, T, E = x.shape
    H = params["wq"].shape[0]
    f32 = jnp.float32
    bf = lambda a: a.astype(jnp.bfloat16)
    q = jnp.einsum("bte,hfe->hbtf", bf(x), bf(params["wq"]), preferred_element_type=f32)
    k = jnp.einsum("bte,hfe->hbtf", bf(x), bf(params["wk"]), preferred_element_type=f32)
    v = jnp.einsum("bte,hfe->hbtf", bf(x), bf(params["wv"]), preferred_element_type=f32)
    scores = jnp.einsum("hbid,hbjd->hbij", bf(q), bf(k), preferred_element_type=f32)
    causal = jnp.triu(jnp.ones((T, T), bool), k=1)
    scores = jnp.where(causal[None, None], -jnp.inf, scores)
    att = jax.nn.softmax(scores, axis=-1)
    ctx = jnp.einsum("hbij,hbjd->hbid", bf(att), bf(v), preferred_element_type=f32)
    concat = jnp.transpose(ctx, (1, 2, 0, 3)).reshape(B, T, H * E)
    out = jnp.einsum("btk,ek->bte", bf(concat), bf(params["w_fc"]),
                     preferred_element_type=f32) + params["b_fc"]
    return out


if __name__ == "__main__":
    # small shapes consistent with the module: batch=2, seq=8, embed=32, heads=2
    B, T, E, H = 2, 8, 32, 2

    key = jax.random.PRNGKey(0)
    kx, kq, kk, kv, kw, kb = jax.random.split(key, 6)

    lim_e = 1.0 / jnp.sqrt(E)
    lim_fc = 1.0 / jnp.sqrt(H * E)
    params = {
        "wq": jax.random.uniform(kq, (H, E, E), jnp.float32, -lim_e, lim_e),
        "wk": jax.random.uniform(kk, (H, E, E), jnp.float32, -lim_e, lim_e),
        "wv": jax.random.uniform(kv, (H, E, E), jnp.float32, -lim_e, lim_e),
        "w_fc": jax.random.uniform(kw, (E, H * E), jnp.float32, -lim_fc, lim_fc),
        "b_fc": jax.random.uniform(kb, (E,), jnp.float32, -lim_fc, lim_fc),
    }
    x = jax.random.normal(kx, (B, T, E), jnp.float32)

    prepared = prepare_params(params)   # hoisted: runs once, not per forward
    out = jax.block_until_ready(self_attention_forward(x, prepared))
    ref = reference_forward(x, params)

    assert out.shape == (B, T, E)
    assert jnp.allclose(out, ref, atol=1e-2, rtol=1e-2), "mismatch vs reference"

    print("KERNEL_OK")
</pallas_src>

<mosaic_0001>
module attributes {stable_mosaic.version = 11 : i64} {
  func.func @_qkv_proj_kernel(%arg0: i32, %arg1: i32, %arg2: memref<16x32xbf16, #tpu.memory_space<vmem>>, %arg3: memref<1x32x32xbf16, #tpu.memory_space<vmem>>, %arg4: memref<1x16x32xbf16, #tpu.memory_space<vmem>>) attributes {dimension_semantics = [#tpu.dimension_semantics<parallel>, #tpu.dimension_semantics<parallel>], iteration_bounds = array<i64: 1, 6>, scalar_prefetch = 0 : i64, scratch_operands = 0 : i64, tpu.core_type = #tpu.core_type<tc>, window_params = [{transform_indices = @transform_0, window_bounds = array<i64: 16, 32>}, {transform_indices = @transform_1, window_bounds = array<i64: 1, 32, 32>}, {transform_indices = @transform_2, window_bounds = array<i64: 1, 16, 32>}]} {
    %c0 = arith.constant 0 : index
    %c0_0 = arith.constant 0 : index
    %0 = vector.load %arg2[%c0, %c0_0] : memref<16x32xbf16, #tpu.memory_space<vmem>>, vector<16x32xbf16>
    %c0_1 = arith.constant 0 : index
    %c0_2 = arith.constant 0 : index
    %c0_3 = arith.constant 0 : index
    %1 = vector.load %arg3[%c0_1, %c0_2, %c0_3] : memref<1x32x32xbf16, #tpu.memory_space<vmem>>, vector<1x32x32xbf16>
    %2 = vector.shape_cast %1 : vector<1x32x32xbf16> to vector<32x32xbf16>
    %cst = arith.constant dense<0.000000e+00> : vector<16x32xf32>
    %3 = tpu.matmul %0, %2, %cst {dimension_numbers = #tpu.dot_dimension_numbers<[1], [0], [0], [1], [0, 0, 1, 1], [], []>} : vector<16x32xbf16>, vector<32x32xbf16>, vector<16x32xf32> -> vector<16x32xf32>
    %4 = arith.truncf %3 : vector<16x32xf32> to vector<16x32xbf16>
    %c0_4 = arith.constant 0 : index
    %c0_5 = arith.constant 0 : index
    %c0_6 = arith.constant 0 : index
    %5 = vector.load %arg4[%c0_4, %c0_5, %c0_6] : memref<1x16x32xbf16, #tpu.memory_space<vmem>>, vector<1x16x32xbf16>
    %6 = vector.shape_cast %5 : vector<1x16x32xbf16> to vector<16x32xbf16>
    %7 = vector.shape_cast %4 : vector<16x32xbf16> to vector<1x16x32xbf16>
    tpu.vector_store %arg4[%c0_4, %c0_5, %c0_6], %7 {strides = array<i32>} : memref<1x16x32xbf16, #tpu.memory_space<vmem>>, vector<1x16x32xbf16>,
    return
  }
  func.func @transform_0(%arg0: i32, %arg1: i32) -> (i32, i32) {
    %c0_i32 = arith.constant 0 : i32
    %c0_i32_0 = arith.constant 0 : i32
    return %arg0, %c0_i32 : i32, i32
  }
  func.func @transform_1(%arg0: i32, %arg1: i32) -> (i32, i32, i32) {
    %c0_i32 = arith.constant 0 : i32
    %c0_i32_0 = arith.constant 0 : i32
    %c0_i32_1 = arith.constant 0 : i32
    return %arg1, %c0_i32, %c0_i32_0 : i32, i32, i32
  }
  func.func @transform_2(%arg0: i32, %arg1: i32) -> (i32, i32, i32) {
    %c0_i32 = arith.constant 0 : i32
    %c0_i32_0 = arith.constant 0 : i32
    return %arg1, %arg0, %c0_i32 : i32, i32, i32
  }
}

</mosaic_0001>

<bundles_post_ra>
// kernel: tpu_custom_call.1
= control target key start
LH: loop header
LB: loop body
LE: loop exit
PB: predicated region body
PF: predicated region fallthrough
CT: control target
= control target key end

     0   :  { %7 = vsyncpa [#allocation3], 0  ;;  %s802_s0 = inlined_call_operand.hbm [shape: bf16[16,32], index: 0, kind: input, shape index: {}]   ;;  %s803_s1 = inlined_call_operand.hbm [shape: bf16[6,32,32], index: 1, kind: input, shape index: {}]   ;;  %s804_s2 = inlined_call_operand.hbm [shape: bf16[6,16,32], index: 2, kind: output, shape index: {}]  }
   0x1   :  { %8 = vsyncpa [#allocation6], 0 }
   0x2   :  { %10 = vsyncpa [#allocation6 + $0x1], 0 }
   0x3   :  { %11 = vsyncpa [#allocation4], 0 }
   0x4   :  { %13 = vsyncpa [#allocation4 + $0x1], 0  ;;  %s648_s9 = smov 0   ;;  %s650_s10 = smov 0  }
   0x5   :  { %s652_s11 = smov 0   ;;  %s654_s12 = smov 0  }
   0x6   :  { %s656_s13 = smov 0   ;;  %s658_s14 = smov 0  }
   0x7 LB: > { %s368_s15 = sadd.s32 4294967295, %s626_s14   ;;  %s369_s16 = sadd.s32 4294967294, %s626_s14   ;;  %s626_s14 = sphi %s658_s14, %s19_s14   ;;  %s622_s13 = sphi %s656_s13, %s816_s13   ;;  %s618_s12 = sphi %s654_s12, %s815_s12   ;;  %s614_s11 = sphi %s652_s11, %s814_s11   ;;  %s610_s10 = sphi %s650_s10, %s813_s10   ;;  %s606_s9 = sphi %s648_s9, %s812_s9  }
   0x8   : > { %p77_p0 = scmp.ne.s32.totalorder %s610_s10, %s606_s9  ;;  %p682_p1 = scmp.eq.s32.totalorder %s368_s15, 0 }
   0x9   : > { %p686_p2 = scmp.eq.s32.totalorder %s368_s15, 5  ;;  %p109_p3 = scmp.eq.s32.totalorder %s369_s16, 5 }
   0xa   : > { %p692_p4 = por %p682_p1, %p77_p0  ;;  %p370_p5 = scmp.ge.s32.totalorder %s626_s14, 1 }
   0xb   : > { %p697_p6 = por %p109_p3, %p77_p0  ;;  %p116_p7 = scmp.lt.s32.totalorder %s626_s14, 7 }
   0xc   : > { %s130_s23 = sshll.u32 %s802_s0, 4  ;;  %s628_s25 = smov [#allocation2]   ;;  %s131_s23 = int_to_ptr.hbm [resolvable:$true] %s130_s23 }
   0xd   : > { %p705_p8 = pnand %p370_p5, %p116_p7  ;;  %s132_s26 = sshll.u32 %s628_s25, 4  ;;  %s133_s26 = int_to_ptr.vmem [resolvable:$true] %s132_s26 }
   0xe   : > { %s629_s27 = smov 64   ;;  %s630_s28 = smov 4  }
   0xf   : > { %p411_p9 = pneg %p705_p8  ;;  %s28_s29 = sadd.s32 1, %s622_s13 }
  0x10   : > { %p29_p11 = scmp.ge.s32.totalorder %s28_s29, 6  ;;  %s64_s30 = sadd.s32 1, %s614_s11 }
  0x11   : > { %p412_p10 = pnand %p411_p9, %p682_p1  ;;  %p71_p12 = scmp.ne.s32.totalorder %s614_s11, %s610_s10 }
  0x12   : > { %p72_p13 = scmp.eq.s32.totalorder %s626_s14, 0  ;;  %s818_s29 = smov (%p29_p11, %s28_s29), 0 }
  0x13   : > { %414 = dma.hbm_to_vmem [thread:$0]  (!%p412_p10), %s131_s23, 128, %s133_s26, [#allocation3], %s629_s27, %s629_s27, %s630_s28  }
  0x14   : > { %p723_p0 = por %p72_p13, %p71_p12  ;;  %p729_p3 = por %p686_p2, %p71_p12 }
  0x15   : > { %s61_s5 = ssub.s32 %s622_s13, %s818_s29  ;;  %p424_p5 = scmp.lt.s32.totalorder %s626_s14, 6 }
  0x16   : > { %p62_p7 = scmp.eq.s32.totalorder %s61_s5, 0  ;;  %s146_s6 = sand.u32 1, %s614_s11  }
  0x17   : > { %s373_s7 = sshll.u32 %s146_s6, 4  ;;  %s398_s15 = sshll.u32 %s622_s13, 4 }
  0x18   : > { %s738_s8 = scalar_select %p62_p7, %s614_s11, %s64_s30  }
  0x19   : > { %s155_s22 = scalar_lea.hbm %s803_s1, %s398_s15  ;;  %s150_s23 = scalar_lea.vmem [#allocation5], %s373_s7 }
  0x1a   : > { %s158_s25 = sshll.u32 %s150_s23, 4  ;;  %s156_s18 = sshll.u32 %s155_s22, 4  ;;  %s159_s25 = int_to_ptr.vmem [resolvable:$true] %s158_s25  ;;  %s157_s18 = int_to_ptr.hbm [resolvable:$true] %s156_s18 }
  0x1b   : > { %p416_p2 = pnand %p424_p5, %p723_p0  ;;  %s147_s26 = scalar_lea.sflag [#allocation6], %s146_s6 }
  0x1c   : > { %170 = sbr.rel (%p705_p8) target bundleno = 186 (0xba), region = 28 }
  0x1d   : > { %418 = dma.hbm_to_vmem [thread:$0]  (!%p416_p2), %s157_s18, 256, %s159_s25, %s147_s26, %s629_s27, %s629_s27, %s630_s28  }
  0x21   : > { %593 = dma.done.wait (%p682_p1), [#allocation3], 128  }
  0x22   : > { %595 = vsyncadd (%p682_p1), [#allocation3], 4294967168  ;;  %s756_s30 = sand.u32 1, %s610_s10  }
  0x23   : > { %s378_s3 = sshll.u32 %s756_s30, 4  ;;  %s178_s5 = scalar_lea.sflag [#allocation6], %s756_s30 }
  0x24   : > { %s181_s6 = scalar_lea.vmem [#allocation5], %s378_s3 }
  0x25   : > { %597 = dma.done.wait (%p692_p4), %s178_s5, 256  }
  0x26   : > { %599 = vsyncadd (%p692_p4), %s178_s5, 4294967040  ;;  %v401_v0 = vld [vmem:[%s181_s6 + $0x8] sm:$0xff]  ;;  %v400_v1 = vld [vmem:[%s181_s6] sm:$0xff]  ;;  %vm229_vm0 = vcmask 261120   ;;  %s379_s17 = sshll.u32 %s756_s30, 3  ;;  %s402_s24 = sshll.u32 %s618_s12, 3 }
  0x27   : > { %239 = vmatpush.bf16.msra.mxu0 %v401_v0  ;;  %v399_v2 = vld [vmem:[#allocation2] sm:$0xff]  ;;  %vm249_vm1 = vcmask 257024   ;;  %s266_s19 = scalar_lea.hbm %s804_s2, %s402_s24  ;;  %s202_s7 = scalar_lea.vmem [#allocation7], %s379_s17 }
  0x28   : > { %s267_s15 = sshll.u32 %s202_s7, 4  ;;  %s269_s16 = sshll.u32 %s266_s19, 4  ;;  %s268_s15 = int_to_ptr.vmem [resolvable:$true] %s267_s15  ;;  %s270_s16 = int_to_ptr.hbm [resolvable:$true] %s269_s16 }
  0x29   : > { %s253_s21 = scalar_lea.sflag [#allocation4], %s756_s30  ;;  %s554_s22 = sshra.s32 %s270_s16, 4  ;;  %s555_s22 = int_to_ptr.hbm [resolvable:$true] %s554_s22 }
  0x2a   : > { %s556_s12 = scalar_lea.hbm %s555_s22, 8  ;;  %s560_s18 = scalar_lea.hbm %s804_s2, 48 }
  0x2b   : > { %240 = vmatpush.bf16.msra.mxu0 %v400_v1  ;;  %p557_p1 = scmp.ne.s32.totalorder %s555_s22, %s556_s12  ;;  %p561_p9 = scmp.lt.s32.totalorder %s555_s22, %s804_s2 }
  0x2c   : > { %p562_p10 = scmp.lt.s32.totalorder %s560_s18, %s556_s12 }
  0x2d   : > { %p558_p4 = pnand %p557_p1, %p729_p3 }
  0x2e   : > { %392 = vmatmul.msk.bf16.vlgmr.msra.gmra.mxu0 %vm229_vm0, %v399_v2  ;;  %p563_p11 = por %p562_p10, %p561_p9 }
  0x2f   : > { %p559_p8 = pneg %p558_p4 }
  0x31   : > { %p564_p12 = pnand %p563_p11, %p559_p8 }
  0xab   : > { %v242_v3 = vpop.f32.mrf.mxu0 }
  0xac   : > { %v247_v4 = vpack.c.bf16 %v242_v3, %v242_v3 }
  0xae   : > { %250 = vst.msk [vmem:[%s202_s7] sm:$0xf] %vm249_vm1, %v247_v4 }
  0xb3   : > { %v244_v5 = vpop.f32.mrf.mxu0 }
  0xb4   : > { %v248_v6 = vpack.c.bf16 %v244_v5, %v244_v5 }
  0xb6   : > { %251 = vst.msk [vmem:[%s202_s7 + $0x4] sm:$0xf] %vm249_vm1, %v248_v6 }
  0xb7   : > { %567 = shalt.err (!%p564_p12)
}
  0xb8   : > { %s631_s30 = smov 64   ;;  %s632_s5 = smov 4  }
  0xb9   : > { %409 = dma.vmem_to_hbm [thread:$0]  (%p729_p3), %s268_s15, 128, %s270_s16, %s253_s21, %s631_s30, %s631_s30, %s632_s5  }
  0xba PF: > { %p426_p13 = scmp.ge.s32.totalorder %s626_s14, 2  ;;  %s284_s6 = sand.u32 1, %s606_s9  }
  0xbb   : > { %s285_s17 = scalar_lea.sflag [#allocation4], %s284_s6 }
  0xbc   : > { %p420_p0 = pnand %p426_p13, %p697_p6 }
  0xbe   : > { %p421_p5 = pneg %p420_p0 }
  0xc0   : > { %601 = dma.done.wait (%p421_p5), %s285_s17, 128  }
  0xc1   : > { %603 = vsyncadd (%p421_p5), %s285_s17, 4294967168  ;;  %s19_s14 = sadd.s32 1, %s626_s14   ;;  %s812_s9 = smov %s610_s10 }
  0xc2   : > { %p16_p7 = scmp.ge.s32.totalorder %s19_s14, 8   ;;  %s813_s10 = smov %s614_s11 }
  0xc3   : > { %s814_s11 = smov %s738_s8  ;;  %s815_s12 = smov %s622_s13 }
  0xc4   : > { %s816_s13 = smov %s818_s29  ;;  %18 = sbr.rel (!%p16_p7) target bundleno = 7 (0x7), region = 79 }
  0xc9   :  { %291 = vsyncpa [#allocation3], 1 }
  0xca   :  { %293 = vsyncpa [#allocation3 + $0x1], 1 }
  0xcb   :  { %294 = vsyncpa [#allocation6], 1 }
  0xcc   :  { %296 = vsyncpa [#allocation6 + $0x1], 1 }
  0xcd   :  { %297 = vsyncpa [#allocation4], 1 }
  0xce   :  { %299 = vsyncpa [#allocation4 + $0x1], 1 }

</bundles_post_ra>
